<compile_context>
chip_gen: v5e
topology: v5e:2x2
jax: 0.10.0
libtpu: 0.0.40
codegen_flags: <defaults>
</compile_context>

<pallas_src>
import jax
import jax.numpy as jnp
from jax import lax
from jax.experimental import pallas as pl
from jax.experimental.pallas import tpu as pltpu


def _round_up(x, m):
    return ((x + m - 1) // m) * m


def _bbox_head_kernel(w_ref, b_ref, x_ref, o_ref):
    # w_ref: (OCP, C)     resident zero-padded weight
    # b_ref: (OCP, 1)     resident f32 bias column
    # x_ref: (1, C, TP)   channel-major activation tile (pixels on lanes)
    # o_ref: (1, TP, OC)  NHWC-layout output tile (permute fused here)
    oc = o_ref.shape[2]
    # MXU in its natural (no-transpose) orientation; f32 accumulation.
    acc = lax.dot_general(
        w_ref[...], x_ref[0],
        dimension_numbers=(((1,), (0,)), ((), ())),   # contract C
        preferred_element_type=jnp.float32,
    )                                                  # (OCP, TP) f32
    acc = acc + b_ref[...]                             # lane-broadcast bias add (VPU)
    # Small in-VMEM transpose of the accumulator only (XLU; hidden under DMA).
    acc_t = jnp.transpose(acc, (1, 0))                 # (TP, OCP)
    o_ref[0] = acc_t[:, :oc].astype(o_ref.dtype)


def bbox_head_forward(x_nchw, weight, bias, *, num_anchors=3,
                      max_pixel_tile=8192,
                      vmem_budget_bytes=24 << 20,
                      compute_dtype=None):
    """RetinaFace BboxHead forward.

    x_nchw : (N, C_in, H, W)
    weight : (A*4, C_in) or (A*4, C_in, 1, 1)  (Conv2d 1x1 weight)
    bias   : (A*4,)
    returns: (N, H*W*A, 4) == conv1x1(x).permute(0,2,3,1).contiguous().view(N,-1,4)
    """
    N, C, H, W = x_nchw.shape
    OC = num_anchors * 4
    weight = jnp.asarray(weight).reshape(OC, C)
    bias = jnp.asarray(bias).reshape(OC)

    if compute_dtype is not None:
        # Halves activation read bytes on a read-bound kernel (bf16 recommended
        # on v6e/v7x); MXU accumulation stays f32.
        x_nchw = x_nchw.astype(compute_dtype)
        weight = weight.astype(compute_dtype)
    out_dtype = x_nchw.dtype

    HW = H * W
    x_cm = x_nchw.reshape(N, C, HW)            # free view of NCHW (channel-major)

    # Pad OC up to a multiple of 8 sublanes (12 -> 16): MXU/transpose friendly.
    OCP = _round_up(OC, 8)
    w_pad = jnp.zeros((OCP, C), weight.dtype).at[:OC].set(weight)
    b_pad = jnp.zeros((OCP, 1), jnp.float32).at[:OC, 0].set(bias.astype(jnp.float32))

    in_isz = jnp.dtype(x_cm.dtype).itemsize
    out_isz = jnp.dtype(out_dtype).itemsize

    # ---- pixel-tile selection --------------------------------------------
    # Double-buffered VMEM bytes per pixel: activation block (C * in_isz) plus
    # the lane-padded (to 128) NHWC output block (128 * out_isz).
    per_px = 2 * C * in_isz + 2 * 128 * out_isz
    vmem_cap = max(512, (int(vmem_budget_bytes) // per_px) // 512 * 512)
    tile_cap = max(512, min(int(max_pixel_tile), vmem_cap))

    n_tiles = pl.cdiv(HW, tile_cap)
    if N == 1 and n_tiles == 1 and HW >= 1024:
        n_tiles = 2                            # keep both v7x TensorCores busy
    # Balanced tiles, multiples of 512 pixels (lane-dense, no tiny last step).
    tp = min(HW, _round_up(pl.cdiv(HW, n_tiles), 512))

    grid = (N, pl.cdiv(HW, tp))

    # Explicit scoped-VMEM limit (v5e default is only 16 MiB).
    vmem_need = (2 * C * tp * in_isz                  # activation double buffer
                 + 2 * tp * 128 * out_isz             # lane-padded output double buffer
                 + 2 * (OCP * C * in_isz + OCP * 4))  # resident weight + bias
    vmem_limit = int(min(max(32 << 20, vmem_need + (8 << 20)), 64 << 20))

    cost = pl.CostEstimate(
        flops=2 * N * HW * C * OC,
        transcendentals=0,
        bytes_accessed=(N * C * HW * in_isz + OCP * C * in_isz + OCP * 4
                        + N * HW * OC * out_isz),
    )

    out_nhwc = pl.pallas_call(
        _bbox_head_kernel,
        out_shape=jax.ShapeDtypeStruct((N, HW, OC), out_dtype),
        grid_spec=pltpu.PrefetchScalarGridSpec(
            num_scalar_prefetch=0,
            grid=grid,
            in_specs=[
                # Constant index maps -> weight/bias stay resident in VMEM
                # (no re-DMA per grid step).
                pl.BlockSpec((OCP, C), lambda n, p: (0, 0)),
                pl.BlockSpec((OCP, 1), lambda n, p: (0, 0)),
                pl.BlockSpec((1, C, tp), lambda n, p: (n, 0, p)),
            ],
            out_specs=pl.BlockSpec((1, tp, OC), lambda n, p: (n, p, 0)),
        ),
        compiler_params=pltpu.CompilerParams(
            dimension_semantics=("parallel", "parallel"),
            vmem_limit_bytes=vmem_limit,
        ),
        cost_estimate=cost,
    )(w_pad, b_pad, x_cm)

    # (N, HW, A*4) -> (N, HW*A, 4): a free view.  Per-pixel channel order is
    # (anchor, coord), identical to PyTorch's permute(0,2,3,1).view(N,-1,4).
    return out_nhwc.reshape(N, HW * num_anchors, 4)


if __name__ == "__main__":
    # Small, module-consistent shapes.
    N, C_in, Hs, Ws = 2, 64, 16, 16
    num_anchors = 3
    OC = num_anchors * 4

    key = jax.random.PRNGKey(0)
    kx, kw, kb = jax.random.split(key, 3)
    x = jax.random.normal(kx, (N, C_in, Hs, Ws), dtype=jnp.float32)
    # Deterministic synthetic Conv2d(C_in, OC, 1) params.
    weight = jax.random.normal(kw, (OC, C_in), dtype=jnp.float32) * 0.05
    bias = jax.random.normal(kb, (OC,), dtype=jnp.float32) * 0.01

    out = bbox_head_forward(x, weight, bias, num_anchors=num_anchors)
    jax.block_until_ready(out)

    # Pure-JAX reference check (1x1 conv == einsum over channels).
    ref = jnp.einsum("nchw,oc->nhwo", x, weight) + bias
    ref = ref.reshape(N, Hs * Ws * num_anchors, 4)
    assert out.shape == (N, Hs * Ws * num_anchors, 4)
    assert jnp.allclose(out, ref, atol=1e-3, rtol=1e-3), float(
        jnp.max(jnp.abs(out - ref)))

    print("KERNEL_OK")
</pallas_src>

<mosaic_0001>
module attributes {stable_mosaic.version = 11 : i64} {
  func.func @_bbox_head_kernel(%arg0: i32, %arg1: i32, %arg2: memref<16x64xf32, #tpu.memory_space<vmem>>, %arg3: memref<16x1xf32, #tpu.memory_space<vmem>>, %arg4: memref<1x64x256xf32, #tpu.memory_space<vmem>>, %arg5: memref<1x256x12xf32, #tpu.memory_space<vmem>>) attributes {dimension_semantics = [#tpu.dimension_semantics<parallel>, #tpu.dimension_semantics<parallel>], iteration_bounds = array<i64: 2, 1>, scalar_prefetch = 0 : i64, scratch_operands = 0 : i64, tpu.core_type = #tpu.core_type<tc>, window_params = [{pipeline_mode = #tpu.pipeline_mode<synchronous>, transform_indices = @transform_0, window_bounds = array<i64: 16, 64>}, {pipeline_mode = #tpu.pipeline_mode<synchronous>, transform_indices = @transform_1, window_bounds = array<i64: 16, 1>}, {transform_indices = @transform_2, window_bounds = array<i64: 1, 64, 256>}, {transform_indices = @transform_3, window_bounds = array<i64: 1, 256, 12>}]} {
    %c0 = arith.constant 0 : index
    %c0_0 = arith.constant 0 : index
    %0 = vector.load %arg2[%c0, %c0_0] : memref<16x64xf32, #tpu.memory_space<vmem>>, vector<16x64xf32>
    %c0_1 = arith.constant 0 : index
    %c0_2 = arith.constant 0 : index
    %c0_3 = arith.constant 0 : index
    %1 = vector.load %arg4[%c0_1, %c0_2, %c0_3] : memref<1x64x256xf32, #tpu.memory_space<vmem>>, vector<1x64x256xf32>
    %2 = vector.shape_cast %1 : vector<1x64x256xf32> to vector<64x256xf32>
    %cst = arith.constant dense<0.000000e+00> : vector<16x256xf32>
    %3 = tpu.matmul %0, %2, %cst {dimension_numbers = #tpu.dot_dimension_numbers<[1], [0], [0], [1], [0, 0, 1, 1], [], []>} : vector<16x64xf32>, vector<64x256xf32>, vector<16x256xf32> -> vector<16x256xf32>
    %c0_4 = arith.constant 0 : index
    %c0_5 = arith.constant 0 : index
    %4 = vector.load %arg3[%c0_4, %c0_5] : memref<16x1xf32, #tpu.memory_space<vmem>>, vector<16x1xf32>
    %5 = vector.broadcast %4 : vector<16x1xf32> to vector<16x256xf32>
    %6 = arith.addf %3, %5 : vector<16x256xf32>
    %7 = tpu.transpose %6, [1, 0] : vector<16x256xf32> -> vector<256x16xf32>
    %8 = vector.extract_strided_slice %7 {offsets = [0, 0], sizes = [256, 12], strides = [1, 1]} : vector<256x16xf32> to vector<256x12xf32>
    %c0_6 = arith.constant 0 : index
    %c0_7 = arith.constant 0 : index
    %c0_8 = arith.constant 0 : index
    %9 = vector.load %arg5[%c0_6, %c0_7, %c0_8] : memref<1x256x12xf32, #tpu.memory_space<vmem>>, vector<1x256x12xf32>
    %10 = vector.shape_cast %9 : vector<1x256x12xf32> to vector<256x12xf32>
    %11 = vector.shape_cast %8 : vector<256x12xf32> to vector<1x256x12xf32>
    tpu.vector_store %arg5[%c0_6, %c0_7, %c0_8], %11 {strides = array<i32>} : memref<1x256x12xf32, #tpu.memory_space<vmem>>, vector<1x256x12xf32>,
    return
  }
  func.func @transform_0(%arg0: i32, %arg1: i32) -> (i32, i32) {
    %c0_i32 = arith.constant 0 : i32
    %c0_i32_0 = arith.constant 0 : i32
    %c0_i32_1 = arith.constant 0 : i32
    return %c0_i32, %c0_i32_0 : i32, i32
  }
  func.func @transform_1(%arg0: i32, %arg1: i32) -> (i32, i32) {
    %c0_i32 = arith.constant 0 : i32
    %c0_i32_0 = arith.constant 0 : i32
    %c0_i32_1 = arith.constant 0 : i32
    return %c0_i32, %c0_i32_0 : i32, i32
  }
  func.func @transform_2(%arg0: i32, %arg1: i32) -> (i32, i32, i32) {
    %c0_i32 = arith.constant 0 : i32
    %c0_i32_0 = arith.constant 0 : i32
    return %arg0, %c0_i32, %arg1 : i32, i32, i32
  }
  func.func @transform_3(%arg0: i32, %arg1: i32) -> (i32, i32, i32) {
    %c0_i32 = arith.constant 0 : i32
    %c0_i32_0 = arith.constant 0 : i32
    return %arg0, %arg1, %c0_i32 : i32, i32, i32
  }
}

</mosaic_0001>

<bundles_post_ra>
// kernel: tpu_custom_call.1
= control target key start
LH: loop header
LB: loop body
LE: loop exit
PB: predicated region body
PF: predicated region fallthrough
CT: control target
= control target key end

     0   :  { %8 = vsyncpa [#allocation3], 0  ;;  %s880_s0 = inlined_call_operand.vmem [shape: f32[16,64], index: 0, kind: input, shape index: {}]   ;;  %s881_s1 = inlined_call_operand.vmem [shape: f32[16,1], index: 1, kind: input, shape index: {}]   ;;  %s882_s2 = inlined_call_operand.hbm [shape: f32[2,64,256], index: 2, kind: input, shape index: {}]   ;;  %s883_s3 = inlined_call_operand.vmem [shape: f32[2,256,12], index: 3, kind: output, shape index: {}]  }
   0x1   :  { %10 = vsyncpa [#allocation3 + $0x1], 0  ;;  %s696_s12 = smov 0   ;;  %s698_s13 = smov 0  }
   0x2   :  { %s700_s14 = smov 0   ;;  %s702_s15 = smov 0  }
   0x3   :  { %s704_s16 = smov 0   ;;  %s706_s17 = smov 0  }
   0x4 LB: > { %s496_s18 = sadd.s32 4294967295, %s671_s17   ;;  %s28_s19 = sadd.s32 1, %s667_s16  ;;  %s671_s17 = sphi %s706_s17, %s16_s17   ;;  %s667_s16 = sphi %s704_s16, %s890_s16   ;;  %s663_s15 = sphi %s702_s15, %s889_s15   ;;  %s659_s14 = sphi %s700_s14, %s888_s14   ;;  %s655_s13 = sphi %s698_s13, %s887_s13   ;;  %s651_s12 = sphi %s696_s12, %s886_s12  }
   0x5   : > { %p30_p0 = scmp.ge.s32.totalorder %s28_s19, 2  ;;  %s79_s20 = sadd.s32 1, %s659_s14 }
   0x6   : > { %p86_p1 = scmp.ne.s32.totalorder %s659_s14, %s655_s13  ;;  %p87_p2 = scmp.eq.s32.totalorder %s671_s17, 0 }
   0x7   : > { %s892_s19 = smov (%p30_p0, %s28_s19), 0  ;;  %p92_p4 = scmp.ne.s32.totalorder %s655_s13, %s651_s12 }
   0x8   : > { %p732_p3 = por %p87_p2, %p86_p1  ;;  %s74_s22 = ssub.s32 %s667_s16, %s892_s19 }
   0x9   : > { %p93_p5 = scmp.eq.s32.totalorder %s496_s18, 0  ;;  %p77_p6 = scmp.eq.s32.totalorder %s74_s22, 0 }
   0xa   : > { %p537_p8 = scmp.lt.s32.totalorder %s671_s17, 2  ;;  %s150_s25 = sand.u32 1, %s659_s14  }
   0xb   : > { %p739_p7 = por %p93_p5, %p92_p4  ;;  %s513_s26 = sshll.u32 %s667_s16, 7 }
   0xc   : > { %s745_s24 = scalar_select %p77_p6, %s659_s14, %s79_s20  }
   0xd   : > { %s500_s27 = sshll.u32 %s150_s25, 7  ;;  %s161_s30 = scalar_lea.hbm %s882_s2, %s513_s26 }
   0xe   : > { %s162_s4 = sshll.u32 %s161_s30, 4  ;;  %s154_s5 = scalar_lea.vmem [#allocation2], %s500_s27  ;;  %s163_s4 = int_to_ptr.hbm [resolvable:$true] %s162_s4 }
   0xf   : > { %s164_s6 = sshll.u32 %s154_s5, 4  ;;  %p534_p9 = pnand %p537_p8, %p732_p3  ;;  %s165_s6 = int_to_ptr.vmem [resolvable:$true] %s164_s6 }
  0x10   : > { %p503_p10 = scmp.ge.s32.totalorder %s671_s17, 1  ;;  %p172_p11 = scmp.lt.s32.totalorder %s671_s17, 3 }
  0x11   : > { %s151_s7 = scalar_lea.sflag [#allocation3], %s150_s25  ;;  %s673_s8 = smov 256  }
  0x12   : > { %s674_s9 = smov 16   ;;  %p173_p12 = pnand %p503_p10, %p172_p11 }
  0x13   : > { %536 = dma.hbm_to_vmem [thread:$0]  (!%p534_p9), %s163_s4, 2048, %s165_s6, %s151_s7, %s673_s8, %s673_s8, %s674_s9  }
  0x14   : > { %176 = sbr.rel (%p173_p12) target bundleno = 457 (0x1c9), region = 32  ;;  %s178_s10 = sand.u32 (!%p173_p12), 1, %s655_s13  }
  0x15   : > { %s504_s11 = sshll.u32 (!%p173_p12), %s178_s10, 7  ;;  %s179_s12 = scalar_lea.sflag (!%p173_p12), [#allocation3], %s178_s10 }
  0x16   : > { %s757_s18 = scalar_lea.vmem (!%p173_p12), [#allocation2], %s504_s11 }
  0x19   : > { %646 = dma.done.wait (%p739_p7), %s179_s12, 2048  }
  0x1a   : > { %648 = vsyncadd (%p739_p7), %s179_s12, 4294965248  ;;  %v675_v0 = vmov 0   ;;  %v237_v1 = vld [vmem:[%s757_s18 + $0x70] sm:$0xff]  ;;  %v238_v2 = vld [vmem:[%s757_s18 + $0x78] sm:$0xff]  ;;  %vm251_vm0 = vcmask 523264   ;;  %p212_p13 = scmp.lt.s32.totalorder %s663_s15, 1 }
  0x1b   : > { %590 = vset.pattern.permute.xlu0 %v675_v0  ;;  %v235_v3 = vld [vmem:[%s757_s18 + $0x60] sm:$0xff]  ;;  %266 = vmatpush.msra.mxu0 %v237_v1  ;;  %v236_v4 = vld [vmem:[%s757_s18 + $0x68] sm:$0xff]  ;;  %v233_v5 = vld [vmem:[%s757_s18 + $0x50] sm:$0xff]  ;;  %vm368_vm1 = vcmask 97280  }
  0x1c   : > { %515 = vmatpush.msra.mxu2 %v237_v1  ;;  %289 = vmatpush.msra.mxu1 %v238_v2  ;;  %v234_v6 = vld [vmem:[%s757_s18 + $0x58] sm:$0xff]  ;;  %v231_v7 = vld [vmem:[%s757_s18 + $0x40] sm:$0xff]  ;;  %v232_v8 = vld [vmem:[%s757_s18 + $0x48] sm:$0xff]  ;;  %s894_s15 = smov (!%p212_p13, %s663_s15), 1 }
  0x1d   : > { %523 = vmatpush.msra.mxu3 %v238_v2  ;;  %267 = vmatpush.msra.mxu0 %v235_v3  ;;  %v229_v9 = vld [vmem:[%s757_s18 + $0x30] sm:$0xff]  ;;  %v230_v10 = vld [vmem:[%s757_s18 + $0x38] sm:$0xff]  ;;  %v227_v11 = vld [vmem:[%s757_s18 + $0x20] sm:$0xff]  ;;  %s514_s29 = sshll.u32 %s894_s15, 8 }
  0x1e   : > { %516 = vmatpush.msra.mxu2 %v235_v3  ;;  %290 = vmatpush.msra.mxu1 %v236_v4  ;;  %v228_v12 = vld [vmem:[%s757_s18 + $0x28] sm:$0xff]  ;;  %v225_v13 = vld [vmem:[%s757_s18 + $0x10] sm:$0xff]  ;;  %v226_v14 = vld [vmem:[%s757_s18 + $0x18] sm:$0xff]  ;;  %s796_s5 = scalar_lea.vmem %s883_s3, %s514_s29 }
  0x1f   : > { %524 = vmatpush.msra.mxu3 %v236_v4  ;;  %268 = vmatpush.msra.mxu0 %v233_v5  ;;  %v223_v15 = vld [vmem:[%s757_s18] sm:$0xff]  ;;  %v224_v16 = vld [vmem:[%s757_s18 + $0x8] sm:$0xff] }
  0x20   : > { %517 = vmatpush.msra.mxu2 %v233_v5  ;;  %291 = vmatpush.msra.mxu1 %v234_v6  ;;  %v221_v17 = vld [vmem:[%s880_s0] sm:$0xff]  ;;  %v222_v18 = vld [vmem:[%s880_s0 + $0x8] sm:$0xff] }
  0x21   : > { %525 = vmatpush.msra.mxu3 %v234_v6  ;;  %269 = vmatpush.msra.mxu0 %v231_v7  ;;  %v239_v19 = vld [vmem:[%s881_s1] sm:$0xff]  ;;  %v240_v20 = vld [vmem:[%s881_s1 + $0x8] sm:$0xff] }
  0x22   : > { %518 = vmatpush.msra.mxu2 %v231_v7  ;;  %292 = vmatpush.msra.mxu1 %v232_v8 }
  0x23   : > { %526 = vmatpush.msra.mxu3 %v232_v8  ;;  %270 = vmatpush.msra.mxu0 %v229_v9 }
  0x24   : > { %519 = vmatpush.msra.mxu2 %v229_v9  ;;  %293 = vmatpush.msra.mxu1 %v230_v10 }
  0x25   : > { %527 = vmatpush.msra.mxu3 %v230_v10  ;;  %271 = vmatpush.msra.mxu0 %v227_v11 }
  0x26   : > { %520 = vmatpush.msra.mxu2 %v227_v11  ;;  %294 = vmatpush.msra.mxu1 %v228_v12 }
  0x27   : > { %528 = vmatpush.msra.mxu3 %v228_v12  ;;  %272 = vmatpush.msra.mxu0 %v225_v13 }
  0x28   : > { %521 = vmatpush.msra.mxu2 %v225_v13  ;;  %295 = vmatpush.msra.mxu1 %v226_v14 }
  0x29   : > { %529 = vmatpush.msra.mxu3 %v226_v14  ;;  %273 = vmatpush.msra.mxu0 %v223_v15 }
  0x2a   : > { %522 = vmatpush.msra.mxu2 %v223_v15  ;;  %296 = vmatpush.msra.mxu1 %v224_v16 }
  0x2b   : > { %530 = vmatpush.msra.mxu3 %v224_v16  ;;  %507 = vmatmul.msk.f32.vlgmr.msra.gmra.mxu0 %vm251_vm0, %v221_v17 }
  0x2c   : > { %508 = vmatmul.msk.f32.vlgmr.msra.gmra.mxu2 %vm251_vm0, %v222_v18  ;;  %509 = vmatmul.msk.f32.vlgmr.msra.gmra.mxu1 %vm251_vm0, %v221_v17 }
  0x2d   : > { %510 = vmatmul.msk.f32.vlgmr.msra.gmra.mxu3 %vm251_vm0, %v222_v18  ;;  %243 = vperm.xlu0 %590, %v239_v19  }
  0x35   : > { %248 = vperm.xlu0 %590, %v240_v20  }
  0x9f   : > { %v244_v21 = vpop.permute.xlu0 %243 }
  0xa7   : > { %v249_v28 = vpop.permute.xlu0 %248 }
  0xa8   : > { %v275_v22 = vpop.f32.mrf.mxu0 }
  0xa9   : > { %v298_v23 = vpop.f32.mrf.mxu1  ;;  %v276_v24 = vadd.f32 %v275_v22, %v244_v21 }
  0xaa   : > { %v299_v25 = vadd.f32 %v298_v23, %v244_v21 }
  0xab   : > { %304 = vxpose.xlu1.b32.start [1/2] (short) %v276_v24, 128 }
  0xac   : > { %336 = vxpose.xlu2.b32.start [1/2] (short) %v299_v25, 128 }
  0xaf   : > { %v278_v26 = vpop.f32.mrf.mxu2 }
  0xb0   : > { %v301_v27 = vpop.f32.mrf.mxu3  ;;  %v279_v29 = vadd.f32 %v278_v26, %v249_v28 }
  0xb1   : > { %v302_v30 = vadd.f32 %v301_v27, %v249_v28 }
  0xb3   : > { %305 = vxpose.xlu1.b32.end [2/2] (short) %v279_v29, 128 }
  0xb4   : > { %337 = vxpose.xlu2.b32.end [2/2] (short) %v302_v30, 128 }
 0x145   : > { %v352_v31 = vpop.trf.xlu2 }
 0x146   : > { %385 = vst.msk [vmem:[%s796_s5 + $0x80] sm:$0xff] %vm368_vm1, %v352_v31 }
 0x14d   : > { %v353_v32 = vpop.trf.xlu2 }
 0x14e   : > { %386 = vst.msk [vmem:[%s796_s5 + $0x88] sm:$0xff] %vm368_vm1, %v353_v32 }
 0x14f   : > { %v320_v33 = vpop.trf.xlu1 }
 0x150   : > { %369 = vst.msk [vmem:[%s796_s5] sm:$0xff] %vm368_vm1, %v320_v33 }
 0x155   : > { %v354_v34 = vpop.trf.xlu2 }
 0x156   : > { %387 = vst.msk [vmem:[%s796_s5 + $0x90] sm:$0xff] %vm368_vm1, %v354_v34 }
 0x157   : > { %v321_v35 = vpop.trf.xlu1 }
 0x158   : > { %370 = vst.msk [vmem:[%s796_s5 + $0x8] sm:$0xff] %vm368_vm1, %v321_v35 }
 0x15d   : > { %v355_v36 = vpop.trf.xlu2 }
 0x15e   : > { %388 = vst.msk [vmem:[%s796_s5 + $0x98] sm:$0xff] %vm368_vm1, %v355_v36 }
 0x15f   : > { %v322_v37 = vpop.trf.xlu1 }
 0x160   : > { %371 = vst.msk [vmem:[%s796_s5 + $0x10] sm:$0xff] %vm368_vm1, %v322_v37 }
 0x165   : > { %v356_v38 = vpop.trf.xlu2 }
 0x166   : > { %389 = vst.msk [vmem:[%s796_s5 + $0xa0] sm:$0xff] %vm368_vm1, %v356_v38 }
 0x167   : > { %v323_v39 = vpop.trf.xlu1 }
 0x168   : > { %372 = vst.msk [vmem:[%s796_s5 + $0x18] sm:$0xff] %vm368_vm1, %v323_v39 }
 0x16d   : > { %v357_v40 = vpop.trf.xlu2 }
 0x16e   : > { %390 = vst.msk [vmem:[%s796_s5 + $0xa8] sm:$0xff] %vm368_vm1, %v357_v40 }
 0x16f   : > { %v324_v41 = vpop.trf.xlu1 }
 0x170   : > { %373 = vst.msk [vmem:[%s796_s5 + $0x20] sm:$0xff] %vm368_vm1, %v324_v41 }
 0x175   : > { %v358_v42 = vpop.trf.xlu2 }
 0x176   : > { %391 = vst.msk [vmem:[%s796_s5 + $0xb0] sm:$0xff] %vm368_vm1, %v358_v42 }
 0x177   : > { %v325_v43 = vpop.trf.xlu1 }
 0x178   : > { %374 = vst.msk [vmem:[%s796_s5 + $0x28] sm:$0xff] %vm368_vm1, %v325_v43 }
 0x17d   : > { %v359_v44 = vpop.trf.xlu2 }
 0x17e   : > { %392 = vst.msk [vmem:[%s796_s5 + $0xb8] sm:$0xff] %vm368_vm1, %v359_v44 }
 0x17f   : > { %v326_v45 = vpop.trf.xlu1 }
 0x180   : > { %375 = vst.msk [vmem:[%s796_s5 + $0x30] sm:$0xff] %vm368_vm1, %v326_v45 }
 0x185   : > { %v360_v46 = vpop.trf.xlu2 }
 0x186   : > { %393 = vst.msk [vmem:[%s796_s5 + $0xc0] sm:$0xff] %vm368_vm1, %v360_v46 }
 0x187   : > { %v327_v47 = vpop.trf.xlu1 }
 0x188   : > { %376 = vst.msk [vmem:[%s796_s5 + $0x38] sm:$0xff] %vm368_vm1, %v327_v47 }
 0x18d   : > { %v361_v48 = vpop.trf.xlu2 }
 0x18e   : > { %394 = vst.msk [vmem:[%s796_s5 + $0xc8] sm:$0xff] %vm368_vm1, %v361_v48 }
 0x18f   : > { %v328_v49 = vpop.trf.xlu1 }
 0x190   : > { %377 = vst.msk [vmem:[%s796_s5 + $0x40] sm:$0xff] %vm368_vm1, %v328_v49 }
 0x195   : > { %v362_v50 = vpop.trf.xlu2 }
 0x196   : > { %395 = vst.msk [vmem:[%s796_s5 + $0xd0] sm:$0xff] %vm368_vm1, %v362_v50 }
 0x197   : > { %v329_v51 = vpop.trf.xlu1 }
 0x198   : > { %378 = vst.msk [vmem:[%s796_s5 + $0x48] sm:$0xff] %vm368_vm1, %v329_v51 }
 0x19d   : > { %v363_v52 = vpop.trf.xlu2 }
 0x19e   : > { %396 = vst.msk [vmem:[%s796_s5 + $0xd8] sm:$0xff] %vm368_vm1, %v363_v52 }
 0x19f   : > { %v330_v53 = vpop.trf.xlu1 }
 0x1a0   : > { %379 = vst.msk [vmem:[%s796_s5 + $0x50] sm:$0xff] %vm368_vm1, %v330_v53 }
 0x1a5   : > { %v364_v54 = vpop.trf.xlu2 }
 0x1a6   : > { %397 = vst.msk [vmem:[%s796_s5 + $0xe0] sm:$0xff] %vm368_vm1, %v364_v54 }
 0x1a7   : > { %v331_v55 = vpop.trf.xlu1 }
 0x1a8   : > { %380 = vst.msk [vmem:[%s796_s5 + $0x58] sm:$0xff] %vm368_vm1, %v331_v55 }
 0x1ad   : > { %v365_v56 = vpop.trf.xlu2 }
 0x1ae   : > { %398 = vst.msk [vmem:[%s796_s5 + $0xe8] sm:$0xff] %vm368_vm1, %v365_v56 }
 0x1af   : > { %v332_v57 = vpop.trf.xlu1 }
 0x1b0   : > { %381 = vst.msk [vmem:[%s796_s5 + $0x60] sm:$0xff] %vm368_vm1, %v332_v57 }
 0x1b5   : > { %v366_v58 = vpop.trf.xlu2 }
 0x1b6   : > { %399 = vst.msk [vmem:[%s796_s5 + $0xf0] sm:$0xff] %vm368_vm1, %v366_v58 }
 0x1b7   : > { %v333_v59 = vpop.trf.xlu1 }
 0x1b8   : > { %382 = vst.msk [vmem:[%s796_s5 + $0x68] sm:$0xff] %vm368_vm1, %v333_v59 }
 0x1bd   : > { %v367_v60 = vpop.trf.xlu2 }
 0x1be   : > { %400 = vst.msk [vmem:[%s796_s5 + $0xf8] sm:$0xff] %vm368_vm1, %v367_v60 }
 0x1bf   : > { %v334_v61 = vpop.trf.xlu1 }
 0x1c0   : > { %383 = vst.msk [vmem:[%s796_s5 + $0x70] sm:$0xff] %vm368_vm1, %v334_v61 }
 0x1c7   : > { %v335_v62 = vpop.trf.xlu1 }
 0x1c8   : > { %384 = vst.msk [vmem:[%s796_s5 + $0x78] sm:$0xff] %vm368_vm1, %v335_v62 }
 0x1c9 PF: > { %s16_s17 = sadd.s32 1, %s671_s17   ;;  %s886_s12 = smov %s655_s13 }
 0x1ca   : > { %p13_p0 = scmp.ge.s32.totalorder %s16_s17, 4   ;;  %s887_s13 = smov %s659_s14 }
 0x1cb   : > { %s888_s14 = smov %s745_s24  ;;  %s889_s15 = smov %s667_s16 }
 0x1cc   : > { %s890_s16 = smov %s892_s19  ;;  %15 = sbr.rel (!%p13_p0) target bundleno = 4 (0x4), region = 72 }
 0x1d1   :  { %431 = vsyncpa [#allocation3], 1 }
 0x1d2   :  { %433 = vsyncpa [#allocation3 + $0x1], 1 }

</bundles_post_ra>
